<compile_context>
chip_gen: v7x
topology: tpu7x:2x2x1
jax: 0.10.0
libtpu: 0.0.40
codegen_flags: <defaults>
</compile_context>

<pallas_src>
import math

import jax
import jax.numpy as jnp
from jax.experimental import pallas as pl
from jax.experimental.pallas import tpu as pltpu


def _round_up(x, m):
    return ((x + m - 1) // m) * m


def _vmem_capacity_bytes():
    """Physical VMEM per TensorCore; conservative 64 MiB (v7x) if unknown."""
    try:
        return int(pltpu.get_tpu_info().vmem_capacity_bytes)
    except Exception:
        return 64 << 20


def _pad2d(a, shape, dtype):
    """Zero-pad a 2-D array up to `shape` and cast to `dtype`."""
    a = a.astype(dtype)
    if a.shape == tuple(shape):
        return a
    out = jnp.zeros(shape, dtype)
    return out.at[: a.shape[0], : a.shape[1]].set(a)


def make_arcface_kernel(scale, cos_m, sin_m, th, mm):
    """Kernel computing one (tb, tc) tile of the scaled ArcFace logits."""

    def kernel(x_ref, w_ref, inv_ref, label_ref, out_ref):
        # --- MXU: (tb, E) @ (E, tc) -> f32 (tb, tc). Canonical contraction
        # over the shared E axis of the pre-transposed [E, C] weight (no
        # transpose / relayout of the weight tile inside the kernel).
        raw = jax.lax.dot_general(
            x_ref[...],
            w_ref[...],
            dimension_numbers=(((1,), (0,)), ((), ())),
            preferred_element_type=jnp.float32,
        )

        # --- fold the precomputed per-class 1/||w_j|| into the f32
        # accumulator: (tb, tc) * (1, tc).  Equivalent to F.normalize(weight)
        # applied before the matmul.
        cosine = raw * inv_ref[...]

        # --- ArcFace margin (all f32; sqrt lands on the EUP slot).
        # 1 - cos^2 <= 1 always, so a single max(., 0) replaces clamp(0, 1).
        sine = jnp.sqrt(jnp.maximum(1.0 - cosine * cosine, 0.0))
        phi = cosine * cos_m - sine * sin_m
        phi = jnp.where(cosine > th, phi, cosine - mm)

        # --- scatter-free one-hot: grid-invariant (1, tc) lane iota compared
        # against the (tb, 1) label block shifted to tile-local coordinates
        # (the offset add is a (tb, 1) op, not a (tb, tc) one).
        tc = cosine.shape[1]
        col = jax.lax.broadcasted_iota(jnp.int32, (1, tc), 1)
        local_label = label_ref[...] - pl.program_id(0) * tc
        out = jnp.where(col == local_label, phi, cosine)

        out_ref[...] = (out * scale).astype(out_ref.dtype)

    return kernel


def arcface2_forward(x, label, weight, s, margin, *, tb=None, tc=None,
                     compute_dtype=jnp.bfloat16, out_dtype=jnp.float32):
    B, E = x.shape
    C, E_w = weight.shape
    assert E == E_w

    tb_given = tb is not None
    tc_given = tc is not None

    in_dsize = jnp.dtype(compute_dtype).itemsize
    out_dsize = jnp.dtype(out_dtype).itemsize

    # Sublane-friendly embedding pad (E stays the un-tiled last dim of x, so
    # small E only wastes lanes on the tiny x tile, not the weight stream).
    E_pad = _round_up(E, 8)

    vmem_cap = _vmem_capacity_bytes()
    vmem_target = int(vmem_cap * 0.70)      # headroom for Mosaic scratch

    # --- class padding / class tile (lane-dense; prefer >=256 so the
    # 256-wide v6e/v7x MXU N dimension is filled; 128 is fine on v5e).
    if tc_given:
        C_pad = _round_up(C, tc)
    else:
        C_pad = _round_up(C, 256) if C > 128 else _round_up(C, 128)
        tc = 128
        for cand in (1024, 512, 256, 128):
            if C_pad % cand == 0:
                tc = cand
                break

    # Double-buffered per-step VMEM budget: x tile, weight tile, output tile,
    # inverse-norm tile, label tile.
    def budget(tb_, tc_):
        return 2 * (tb_ * E_pad * in_dsize + E_pad * tc_ * in_dsize
                    + tb_ * tc_ * out_dsize + tc_ * 4 + tb_ * 4)

    # --- batch tile: largest multiple of 8 up to 512 that fits the budget.
    if not tb_given:
        tb = min(512, _round_up(B, 8))
        while tb > 8 and budget(tb, tc) > vmem_target:
            tb = _round_up(tb // 2, 8)
    B_pad = _round_up(B, tb)

    # If the weight/output tiles alone break the budget, shrink the class tile.
    if not tc_given:
        while tc > 128 and budget(tb, tc) > vmem_target and C_pad % (tc // 2) == 0:
            tc //= 2

    # --- v7x megacore: keep at least 2 grid steps along a parallel axis
    # whenever the problem allows it (otherwise one TensorCore sits idle).
    if (C_pad // tc) * (B_pad // tb) < 2:
        adjusted = False
        if not tc_given:
            for cand in (512, 256, 128):
                if cand < tc and C_pad % cand == 0:
                    tc = cand
                    adjusted = True
                    break
        if not adjusted and not tb_given and tb > 8:
            tb = _round_up(tb // 2, 8)
            B_pad = _round_up(B, tb)

    # --- constants -----------------------------------------------------------
    cos_m = math.cos(margin)
    sin_m = math.sin(margin)
    th = math.cos(math.pi - margin)
    mm = math.sin(math.pi - margin) * margin

    # Per-class inverse L2 norm, computed once in f32 (F.normalize semantics:
    # clamp the norm at eps=1e-12 before inversion).  Padded classes get 0 so
    # their cosine is exactly 0 (finite; never selected since label < C).
    w32 = weight.astype(jnp.float32)
    inv = 1.0 / jnp.maximum(jnp.sqrt(jnp.sum(w32 * w32, axis=1)), 1e-12)

    # --- padded / pre-transposed operands -------------------------------------
    x_p = _pad2d(x, (B_pad, E_pad), compute_dtype)
    w_t = _pad2d(weight.T, (E_pad, C_pad), compute_dtype)          # [E, C]
    inv_norm = _pad2d(inv.reshape(1, C), (1, C_pad), jnp.float32)
    lab = _pad2d(label.reshape(B, 1), (B_pad, 1), jnp.int32)

    kernel = make_arcface_kernel(float(s), cos_m, sin_m, th, mm)

    # Always set the scoped VMEM limit explicitly (v5e default is only 16 MiB)
    # and clamp it below physical VMEM (v7x: 64 MiB per TensorCore).
    vmem_bytes = budget(tb, tc)
    vmem_limit = int(min(max(vmem_bytes * 1.25, 16 << 20), vmem_cap - (8 << 20)))

    cost = pl.CostEstimate(
        flops=2 * B_pad * C_pad * E_pad,
        transcendentals=B_pad * C_pad,                              # sqrt per logit
        bytes_accessed=(C_pad * E_pad + B_pad * E_pad) * in_dsize
                       + B_pad * C_pad * out_dsize + B_pad * 4 + C_pad * 4,
    )

    # Note: if the weight DMA is ever exposed at very large C, add
    # pipeline_mode=pl.Buffered(3) to the weight BlockSpec (and account for the
    # extra tc*E buffer in the VMEM budget); prefer a larger tc on v7x instead.
    out = pl.pallas_call(
        kernel,
        out_shape=jax.ShapeDtypeStruct((B_pad, C_pad), out_dtype),
        grid_spec=pltpu.PrefetchScalarGridSpec(
            num_scalar_prefetch=0,
            # class axis OUTER, batch axis INNER: weight tile stays resident
            # across batch tiles -> weight streamed from HBM exactly once.
            grid=(C_pad // tc, B_pad // tb),
            in_specs=[
                pl.BlockSpec((tb, E_pad), lambda c, b: (b, 0)),    # x rows
                pl.BlockSpec((E_pad, tc), lambda c, b: (0, c)),    # weight [E, C] tile
                pl.BlockSpec((1, tc), lambda c, b: (0, c)),        # 1/||w|| tile
                pl.BlockSpec((tb, 1), lambda c, b: (b, 0)),        # labels
            ],
            out_specs=pl.BlockSpec((tb, tc), lambda c, b: (b, c)),
        ),
        compiler_params=pltpu.CompilerParams(
            dimension_semantics=("parallel", "parallel"),
            vmem_limit_bytes=vmem_limit,
        ),
        cost_estimate=cost,
    )(x_p, w_t, inv_norm, lab)

    return out[:B, :C]


def arcface2_reference(x, label, weight, s, margin):
    """Pure-JAX f32 reference mirroring the PyTorch forward."""
    cos_m = math.cos(margin)
    sin_m = math.sin(margin)
    th = math.cos(math.pi - margin)
    mm = math.sin(math.pi - margin) * margin

    norm = jnp.sqrt(jnp.sum(weight * weight, axis=1, keepdims=True))
    w_n = weight / jnp.maximum(norm, 1e-12)
    cosine = jnp.matmul(x, w_n.T, precision=jax.lax.Precision.HIGHEST)
    sine = jnp.sqrt(jnp.clip(1.0 - cosine ** 2, 0.0, 1.0))
    phi = cosine * cos_m - sine * sin_m
    phi = jnp.where(cosine > th, phi, cosine - mm)
    one_hot = label[:, None] == jnp.arange(weight.shape[0])[None, :]
    return jnp.where(one_hot, phi, cosine) * s


if __name__ == "__main__":
    s, margin = 64.0, 0.5
    key = jax.random.PRNGKey(0)
    kx, kw, kl, kx2, kw2, kl2 = jax.random.split(key, 6)

    # Small shapes consistent with the module: embedding_size=64, num_classes=128.
    B, E, C = 8, 64, 128
    x = jax.random.normal(kx, (B, E), dtype=jnp.float32)
    # Deterministic xavier_uniform-style init for weight [C, E].
    bound = math.sqrt(6.0 / (E + C))
    weight = jax.random.uniform(kw, (C, E), dtype=jnp.float32,
                                minval=-bound, maxval=bound)
    label = jax.random.randint(kl, (B,), 0, C, dtype=jnp.int32)

    ref = arcface2_reference(x, label, weight, s, margin)

    # 1) f32-operand path: tight check against the f32 reference.
    out_f32 = jax.block_until_ready(
        arcface2_forward(x, label, weight, s, margin, compute_dtype=jnp.float32))
    assert out_f32.shape == (B, C)
    assert jnp.allclose(out_f32, ref, atol=1e-3, rtol=1e-4), "f32 mismatch"

    # 2) Default bf16-operand path: tight check against a reference built from
    #    the same bf16-rounded operands (f32 accumulate / f32 margin math),
    #    plus a loose sanity check against the true f32 reference.
    out_bf16 = jax.block_until_ready(arcface2_forward(x, label, weight, s, margin))
    assert out_bf16.shape == (B, C)
    x_r = x.astype(jnp.bfloat16).astype(jnp.float32)
    w_r = weight.astype(jnp.bfloat16).astype(jnp.float32)
    inv_r = 1.0 / jnp.maximum(jnp.sqrt(jnp.sum(weight * weight, axis=1)), 1e-12)
    cos_m_, sin_m_ = math.cos(margin), math.sin(margin)
    th_, mm_ = math.cos(math.pi - margin), math.sin(math.pi - margin) * margin
    cos_r = jnp.matmul(x_r, w_r.T, precision=jax.lax.Precision.HIGHEST) * inv_r[None, :]
    sin_r = jnp.sqrt(jnp.maximum(1.0 - cos_r * cos_r, 0.0))
    phi_r = jnp.where(cos_r > th_, cos_r * cos_m_ - sin_r * sin_m_, cos_r - mm_)
    oh_r = label[:, None] == jnp.arange(C)[None, :]
    ref_bf = jnp.where(oh_r, phi_r, cos_r) * s
    assert jnp.allclose(out_bf16, ref_bf, atol=5e-2, rtol=1e-4), "bf16 mismatch"
    assert jnp.allclose(out_bf16, ref, atol=2.0, rtol=1e-1), "bf16 sanity mismatch"

    # 3) Non-aligned shapes exercise the pad-and-slice path (f32 operands).
    B2, E2, C2 = 10, 48, 200
    x2 = jax.random.normal(kx2, (B2, E2), dtype=jnp.float32)
    w2 = jax.random.uniform(kw2, (C2, E2), dtype=jnp.float32, minval=-0.1, maxval=0.1)
    l2 = jax.random.randint(kl2, (B2,), 0, C2, dtype=jnp.int32)
    ref2 = arcface2_reference(x2, l2, w2, s, margin)
    out2 = jax.block_until_ready(
        arcface2_forward(x2, l2, w2, s, margin, compute_dtype=jnp.float32))
    assert out2.shape == (B2, C2)
    assert jnp.allclose(out2, ref2, atol=1e-3, rtol=1e-4), "padded-shape mismatch"

    print("KERNEL_OK")
</pallas_src>

<mosaic_0001>
module attributes {stable_mosaic.version = 11 : i64} {
  func.func @kernel(%arg0: i32, %arg1: i32, %arg2: memref<8x64xf32, #tpu.memory_space<vmem>>, %arg3: memref<64x128xf32, #tpu.memory_space<vmem>>, %arg4: memref<1x128xf32, #tpu.memory_space<vmem>>, %arg5: memref<8x1xi32, #tpu.memory_space<vmem>>, %arg6: memref<8x128xf32, #tpu.memory_space<vmem>>) attributes {dimension_semantics = [#tpu.dimension_semantics<parallel>, #tpu.dimension_semantics<parallel>], iteration_bounds = array<i64: 1, 1>, scalar_prefetch = 0 : i64, scratch_operands = 0 : i64, tpu.core_type = #tpu.core_type<tc>, window_params = [{transform_indices = @transform_0, window_bounds = array<i64: 8, 64>}, {transform_indices = @transform_1, window_bounds = array<i64: 64, 128>}, {transform_indices = @transform_2, window_bounds = array<i64: 1, 128>}, {transform_indices = @transform_3, window_bounds = array<i64: 8, 1>}, {transform_indices = @transform_4, window_bounds = array<i64: 8, 128>}]} {
    %c0 = arith.constant 0 : index
    %c0_0 = arith.constant 0 : index
    %0 = vector.load %arg2[%c0, %c0_0] : memref<8x64xf32, #tpu.memory_space<vmem>>, vector<8x64xf32>
    %c0_1 = arith.constant 0 : index
    %c0_2 = arith.constant 0 : index
    %1 = vector.load %arg3[%c0_1, %c0_2] : memref<64x128xf32, #tpu.memory_space<vmem>>, vector<64x128xf32>
    %cst = arith.constant dense<0.000000e+00> : vector<8x128xf32>
    %2 = tpu.matmul %0, %1, %cst {dimension_numbers = #tpu.dot_dimension_numbers<[1], [0], [0], [1], [0, 0, 1, 1], [], []>} : vector<8x64xf32>, vector<64x128xf32>, vector<8x128xf32> -> vector<8x128xf32>
    %c0_3 = arith.constant 0 : index
    %c0_4 = arith.constant 0 : index
    %3 = vector.load %arg4[%c0_3, %c0_4] : memref<1x128xf32, #tpu.memory_space<vmem>>, vector<1x128xf32>
    %4 = vector.broadcast %3 : vector<1x128xf32> to vector<8x128xf32>
    %5 = arith.mulf %2, %4 : vector<8x128xf32>
    %6 = arith.mulf %5, %5 : vector<8x128xf32>
    %cst_5 = arith.constant 1.000000e+00 : f32
    %7 = vector.broadcast %cst_5 : f32 to vector<8x128xf32>
    %8 = arith.subf %7, %6 : vector<8x128xf32>
    %cst_6 = arith.constant 0.000000e+00 : f32
    %9 = vector.broadcast %cst_6 : f32 to vector<8x128xf32>
    %10 = arith.maximumf %8, %9 : vector<8x128xf32>
    %11 = math.sqrt %10 : vector<8x128xf32>
    %cst_7 = arith.constant 0.87758255 : f32
    %12 = vector.broadcast %cst_7 : f32 to vector<8x128xf32>
    %13 = arith.mulf %5, %12 : vector<8x128xf32>
    %cst_8 = arith.constant 0.47942555 : f32
    %14 = vector.broadcast %cst_8 : f32 to vector<8x128xf32>
    %15 = arith.mulf %11, %14 : vector<8x128xf32>
    %16 = arith.subf %13, %15 : vector<8x128xf32>
    %cst_9 = arith.constant -0.87758255 : f32
    %17 = vector.broadcast %cst_9 : f32 to vector<8x128xf32>
    %18 = arith.cmpf ogt, %5, %17 : vector<8x128xf32>
    %cst_10 = arith.constant 0.239712775 : f32
    %19 = vector.broadcast %cst_10 : f32 to vector<8x128xf32>
    %20 = arith.subf %5, %19 : vector<8x128xf32>
    %21 = arith.select %18, %16, %20 : vector<8x128xi1>, vector<8x128xf32>
    %22 = tpu.iota {dimensions = array<i32: 1>} : vector<1x128xi32>
    %c0_11 = arith.constant 0 : index
    %c0_12 = arith.constant 0 : index
    %23 = vector.load %arg5[%c0_11, %c0_12] : memref<8x1xi32, #tpu.memory_space<vmem>>, vector<8x1xi32>
    %c128_i32 = arith.constant 128 : i32
    %24 = arith.muli %arg0, %c128_i32 : i32
    %25 = vector.broadcast %24 : i32 to vector<8x1xi32>
    %26 = arith.subi %23, %25 : vector<8x1xi32>
    %27 = vector.broadcast %22 : vector<1x128xi32> to vector<8x128xi32>
    %28 = vector.broadcast %26 : vector<8x1xi32> to vector<8x128xi32>
    %29 = arith.cmpi eq, %27, %28 : vector<8x128xi32>
    %30 = arith.select %29, %21, %5 : vector<8x128xi1>, vector<8x128xf32>
    %cst_13 = arith.constant 6.400000e+01 : f32
    %31 = vector.broadcast %cst_13 : f32 to vector<8x128xf32>
    %32 = arith.mulf %30, %31 : vector<8x128xf32>
    %c0_14 = arith.constant 0 : index
    %c0_15 = arith.constant 0 : index
    %33 = vector.load %arg6[%c0_14, %c0_15] : memref<8x128xf32, #tpu.memory_space<vmem>>, vector<8x128xf32>
    tpu.vector_store %arg6[%c0_14, %c0_15], %32 {strides = array<i32>} : memref<8x128xf32, #tpu.memory_space<vmem>>, vector<8x128xf32>,
    return
  }
  func.func @transform_0(%arg0: i32, %arg1: i32) -> (i32, i32) {
    %c0_i32 = arith.constant 0 : i32
    %c0_i32_0 = arith.constant 0 : i32
    return %arg1, %c0_i32 : i32, i32
  }
  func.func @transform_1(%arg0: i32, %arg1: i32) -> (i32, i32) {
    %c0_i32 = arith.constant 0 : i32
    %c0_i32_0 = arith.constant 0 : i32
    return %c0_i32, %arg0 : i32, i32
  }
  func.func @transform_2(%arg0: i32, %arg1: i32) -> (i32, i32) {
    %c0_i32 = arith.constant 0 : i32
    %c0_i32_0 = arith.constant 0 : i32
    return %c0_i32, %arg0 : i32, i32
  }
  func.func @transform_3(%arg0: i32, %arg1: i32) -> (i32, i32) {
    %c0_i32 = arith.constant 0 : i32
    %c0_i32_0 = arith.constant 0 : i32
    return %arg1, %c0_i32 : i32, i32
  }
  func.func @transform_4(%arg0: i32, %arg1: i32) -> (i32, i32) {
    %c0_i32 = arith.constant 0 : i32
    return %arg1, %arg0 : i32, i32
  }
}

</mosaic_0001>

<bundles_post_ra>
// kernel: tpu_custom_call.1
= control target key start
LH: loop header
LB: loop body
LE: loop exit
PB: predicated region body
PF: predicated region fallthrough
CT: control target
= control target key end

     0   :  { %9 = vsyncpa [#allocation3], 0  ;;  %s335_s0 = inlined_call_operand.vmem [shape: f32[8,64], index: 0, kind: input, shape index: {}]   ;;  %s336_s1 = inlined_call_operand.hbm [shape: f32[64,128], index: 1, kind: input, shape index: {}]   ;;  %s337_s2 = inlined_call_operand.vmem [shape: f32[1,128], index: 2, kind: input, shape index: {}]   ;;  %s338_s3 = inlined_call_operand.vmem [shape: s32[8,1], index: 3, kind: input, shape index: {}]   ;;  %s339_s4 = inlined_call_operand.hbm [shape: f32[8,128], index: 4, kind: output, shape index: {}]  }
   0x1   :  { %10 = vsyncpa [#allocation4], 0  ;;  %s269_s15 = smov [#allocation2]   ;;  %s221_s19 = scalar_lea.hbm %s336_s1, 1024 }
   0x2   :  { %s18_s16 = sshll.u32 %s269_s15, 4  ;;  %p222_p0 = scmp.ne.s32.totalorder %s336_s1, %s221_s19  ;;  %s19_s16 = int_to_ptr.vmem [resolvable:$true] %s18_s16 }
   0x3   :  { %p225_p1 = scmp.lt.u32.totalorder %s221_s19, %s336_s1 }
   0x5   :  { %p227_p2 = pnand %p225_p1, %p222_p0 }
   0x7   :  { %230 = shalt.err (!%p227_p2)
}
   0x8   :  { %s231_s24 = scalar_lea.vmem %s19_s16, 1024  ;;  %p236_p4 = scmp.lt.s32.totalorder %s19_s16, %s19_s16 }
   0x9   :  { %p232_p3 = scmp.ne.s32.totalorder %s19_s16, %s231_s24  ;;  %p237_p5 = scmp.lt.s32.totalorder %s231_s24, %s231_s24 }
   0xb   :  { %p238_p6 = por %p237_p5, %p236_p4 }
   0xd   :  { %p239_p7 = pnand %p238_p6, %p232_p3 }
   0xf   :  { %242 = shalt.err (!%p239_p7)
}
  0x10   :  { %s270_s25 = smov 128   ;;  %s271_s26 = smov 8  }
  0x11   :  { %24 = dma.hbm_to_vmem [thread:$0]  %s336_s1, 1024, %s19_s16, [#allocation3], %s270_s25, %s270_s25, %s271_s26  }
  0x12   :  { %265 = dma.done.wait [#allocation3], 1024  }
  0x13   :  { %266 = vsyncadd [#allocation3], 4294966272  ;;  %v272_v0 = vmov 0.0|0.0   ;;  %vm273_vm0 = vmmov 0   ;;  %v274_v1 = vmov 0.0   ;;  %v275_v2 = vmov 0  }
  0x14   :  { %198 = vmatprep.subr.bf16.mxu0 %v272_v0  ;;  %195 = vmatprep.mubr.msk.f32.mxu0 %vm273_vm0, %v274_v1  ;;  %v33_v3 = vld [vmem:[#allocation2] sm:$0xff]  ;;  %v34_v4 = vld [vmem:[#allocation2 + $0x8] sm:$0xff]  ;;  %v35_v5 = vld [vmem:[#allocation2 + $0x10] sm:$0xff]  ;;  %vm41_vm1 = vcmask 523264   ;;  %v139_v24 = vlaneseq }
  0x15   :  { %218 = vset.pattern.permute.xlu0 %v275_v2  ;;  %v199_v6 = vpack.c.bf16 %v34_v4, %v33_v3  ;;  %v36_v7 = vld [vmem:[#allocation2 + $0x18] sm:$0xff]  ;;  %v141_v9 = vld [vmem:[%s338_s3] sm:$0xff]  ;;  %v38_v11 = vld [vmem:[#allocation2 + $0x28] sm:$0xff] }
  0x16   :  { %v202_v8 = vpack.c.bf16 %v36_v7, %v35_v5  ;;  %v37_v10 = vld [vmem:[#allocation2 + $0x20] sm:$0xff]  ;;  %146 = vperm.xlu0 %218, %v141_v9   ;;  %v39_v13 = vld [vmem:[#allocation2 + $0x30] sm:$0xff]  ;;  %v40_v14 = vld [vmem:[#allocation2 + $0x38] sm:$0xff]  ;;  %v140_v28 = vand.u32 127, %v139_v24 }
  0x17   :  { %200 = vmatpush3.bf16.msra.mxu0 %v199_v6  ;;  %v205_v12 = vpack.c.bf16 %v38_v11, %v37_v10  ;;  %v208_v15 = vpack.c.bf16 %v40_v14, %v39_v13  ;;  %v32_v16 = vld [vmem:[%s335_s0] sm:$0xff]  ;;  %s276_s0 = smov [#allocation5]  }
  0x18   :  { %201 = vmatprep.subr.bf16.mxu0 %v272_v0  ;;  %v168_v17 = vld [vmem:[%s337_s2] ss:$0 sm:$0xff]  ;;  %s158_s2 = sshll.u32 %s276_s0, 4  ;;  %s159_s2 = int_to_ptr.vmem [resolvable:$true] %s158_s2 }
  0x19   :  { %s243_s7 = scalar_lea.vmem %s159_s2, 128  ;;  %p248_p9 = scmp.lt.s32.totalorder %s159_s2, %s159_s2 }
  0x1a   :  { %p244_p8 = scmp.ne.s32.totalorder %s159_s2, %s243_s7  ;;  %p249_p10 = scmp.lt.s32.totalorder %s243_s7, %s243_s7 }
  0x1b   :  { %203 = vmatpush3.bf16.msra.mxu0 %v202_v8 }
  0x1c   :  { %204 = vmatprep.subr.bf16.mxu0 %v272_v0  ;;  %p250_p11 = por %p249_p10, %p248_p9 }
  0x1e   :  { %p251_p12 = pnand %p250_p11, %p244_p8 }
  0x1f   :  { %206 = vmatpush3.bf16.msra.mxu0 %v205_v12 }
  0x20   :  { %207 = vmatprep.subr.bf16.mxu0 %v272_v0 }
  0x23   :  { %209 = vmatpush3.bf16.msra.mxu0 %v208_v15 }
  0x26   :  { %196 = vmatmul.mubr.msk.f32.vlgmr.msra.gmra.mrb[0].mxu0 %vm41_vm1, %v32_v16 }
  0x95   :  { %v147_v30 = vpop.permute.xlu0 %146 }
  0x96   :  { %vm148_vm4 = vcmp.eq.s32.totalorder %v140_v28, %v147_v30 }
  0xf9   :  { %v111_v18 = vpop.f32.mrb[0].mxu0 }
  0xfa   :  { %v122_v19 = vmul.f32 %v168_v17, %v111_v18  ;;  %v197_v20 = vpop.f32.mrb[1].mxu0 }
  0xfc   :  { %v123_v21 = vmul.f32 %v122_v19, %v122_v19  ;;  %v133_v32 = vmul.f32 0.87758255, %v122_v19  ;;  %v169_v35 = vadd.f32 -0.23971277, %v122_v19  ;;  %vm136_vm5 = vcmp.gt.f32.partialorder %v122_v19, -0.87758255 }
  0xfe   :  { %v124_v22 = vsub.f32 1.0, %v123_v21 }
 0x100   :  { %v125_v23 = vmax.f32 %v124_v22, 0.0 }
 0x102   :  { %219 = vrsqrt.f32 %v125_v23  ;;  %vm128_vm2 = vcmp.eq.f32.partialorder %v125_v23, inf  ;;  %v131_v27 = vand.u32 2147483648, %v125_v23  ;;  %vm130_vm3 = vcmp.eq.f32.partialorder %v125_v23, 0.0 }
 0x10c   :  { %v220_v25 = vpop.eup %219 }
 0x10d   :  { %v127_v26 = vmul.f32 %v220_v25, %v125_v23 }
 0x10f   :  { %v129_v29 = vsel %vm128_vm2, %v125_v23, %v127_v26 }
 0x110   :  { %v132_v31 = vsel %vm130_vm3, %v131_v27, %v129_v29 }
 0x111   :  { %v134_v33 = vmul.f32 0.47942555, %v132_v31 }
 0x113   :  { %v135_v34 = vsub.f32 %v133_v32, %v134_v33 }
 0x115   :  { %v138_v36 = vsel %vm136_vm5, %v135_v34, %v169_v35 }
 0x116   :  { %v149_v37 = vsel %vm148_vm4, %v138_v36, %v122_v19 }
 0x117   :  { %v150_v38 = vmul.f32 64.0, %v149_v37 }
 0x119   :  { %151 = vst [vmem:[#allocation5] sm:$0xff] %v150_v38 }
 0x11a   :  { %254 = shalt.err (!%p251_p12)
}
 0x11b   :  { %s255_s10 = scalar_lea.hbm %s339_s4, 128 }
 0x11c   :  { %p256_p13 = scmp.ne.s32.totalorder %s339_s4, %s255_s10  ;;  %p259_p0 = scmp.lt.u32.totalorder %s255_s10, %s339_s4 }
 0x11e   :  { %p261_p1 = pnand %p259_p0, %p256_p13 }
 0x120   :  { %264 = shalt.err (!%p261_p1)
}
 0x121   :  { %161 = dma.vmem_to_hbm [thread:$0]  %s159_s2, 128, %s339_s4, [#allocation4]  }
 0x122   :  { %267 = dma.done.wait [#allocation4], 128  }
 0x123   :  { %268 = vsyncadd [#allocation4], 4294967168 }
 0x124   :  { %165 = vsyncpa [#allocation3], 1 }
 0x125   :  { %166 = vsyncpa [#allocation4], 1 }

</bundles_post_ra>
